<compile_context>
chip_gen: v6e
topology: v6e:2x2x1
jax: 0.10.0
libtpu: 0.0.40
codegen_flags: <defaults>
</compile_context>

<pallas_src>
import functools

import jax
import jax.numpy as jnp
from jax.experimental import pallas as pl
from jax.experimental.pallas import tpu as pltpu


def _layernorm2d_kernel(x_ref, gamma_ref, beta_ref, o_ref, *, eps):
    # x_ref: (1, R, L) block = one full sample; R = C*k rows, L = HW//k lanes.
    x = x_ref[...].astype(jnp.float32)
    n = x.shape[1] * x.shape[2]                      # C*H*W elements / sample

    # Single pass over the tile for the statistics.
    s = jnp.sum(x)
    ss = jnp.sum(x * x)
    mean = s / n
    # torch.std default is unbiased (ddof=1): divide by n-1.
    var = jnp.maximum(ss - s * mean, 0.0) / (n - 1)
    inv = 1.0 / (jnp.sqrt(var) + eps)                # eps added to std, not var

    # Fold normalization + per-channel affine into one scale/shift per row.
    a = gamma_ref[...] * inv                         # (R, 1)
    b = beta_ref[...] - mean * a                     # (R, 1)
    o_ref[...] = (x * a[None, :, :] + b[None, :, :]).astype(o_ref.dtype)


def _choose_row_packing(C, HW):
    """Pick k so the per-sample tile (C*k, HW//k) is sublane(8)/lane(128) dense."""
    if HW % 128 != 0 or C % 8 == 0:
        return 1                                     # block == full dims: legal
    best = 1
    for k in (2, 4, 8, 16, 32, 64, 128):
        if HW % k != 0 or (HW // k) % 128 != 0:
            continue
        best = k
        if (C * k) % 8 == 0:
            return k
    return best


def layernorm2d(x, gamma, beta, *, eps=1e-6):
    """x: (N, C, H, W). gamma, beta: (C,). Matches PyTorch LayerNorm2d.forward."""
    N, C, H, W = x.shape
    HW = H * W

    # Repack each sample so sublanes are full and lanes are an x128 multiple.
    k = _choose_row_packing(C, HW)
    R, L = C * k, HW // k
    x3 = x.reshape(N, R, L)
    # Row r of the repacked sample belongs to channel r // k.
    gamma2 = jnp.repeat(gamma.astype(jnp.float32), k).reshape(R, 1)
    beta2 = jnp.repeat(beta.astype(jnp.float32), k).reshape(R, 1)

    # VMEM budget: double-buffered in+out full-sample blocks + f32 temporaries.
    sample_bytes = C * HW * x.dtype.itemsize
    try:
        phys_vmem = pltpu.get_tpu_info().vmem_capacity_bytes
    except Exception:
        phys_vmem = 64 << 20          # v7x has the smallest VMEM (64 MiB / TC)
    vmem_limit = int(min(max(32 << 20, 8 * sample_bytes + (8 << 20)),
                         int(phys_vmem * 0.85)))
    # TODO(synk): for samples where C*HW*4 approaches the VMEM budget (esp. the
    # v7x 64 MiB case), switch to an HW-tiled two-phase grid: accumulate
    # sum/sumsq across HW tiles (pl.when init on tile 0), then a second
    # normalize sweep using the folded a/b scale/shift.

    kernel = functools.partial(_layernorm2d_kernel, eps=eps)

    out = pl.pallas_call(
        kernel,
        out_shape=jax.ShapeDtypeStruct((N, R, L), x.dtype),
        grid_spec=pltpu.PrefetchScalarGridSpec(
            num_scalar_prefetch=0,
            grid=(N,),
            in_specs=[
                pl.BlockSpec((1, R, L), lambda i: (i, 0, 0)),
                pl.BlockSpec((R, 1), lambda i: (0, 0)),
                pl.BlockSpec((R, 1), lambda i: (0, 0)),
            ],
            out_specs=pl.BlockSpec((1, R, L), lambda i: (i, 0, 0)),
        ),
        compiler_params=pltpu.CompilerParams(
            dimension_semantics=("parallel",),
            vmem_limit_bytes=vmem_limit,
        ),
        cost_estimate=pl.CostEstimate(
            flops=6 * N * C * HW,                    # stats + scale/shift
            transcendentals=N,                       # one sqrt per sample
            bytes_accessed=2 * N * sample_bytes,     # read + write each sample
        ),
    )(x3, gamma2, beta2)

    return out.reshape(N, C, H, W)


def _reference(x, gamma, beta, eps=1e-6):
    # Pure-JAX reference matching the PyTorch forward exactly.
    N = x.shape[0]
    flat = x.reshape(N, -1).astype(jnp.float32)
    mean = flat.mean(axis=1).reshape(N, 1, 1, 1)
    std = jnp.sqrt(
        jnp.sum((flat - flat.mean(axis=1, keepdims=True)) ** 2, axis=1)
        / (flat.shape[1] - 1)
    ).reshape(N, 1, 1, 1)
    y = (x.astype(jnp.float32) - mean) / (std + eps)
    y = gamma.reshape(1, -1, 1, 1) * y + beta.reshape(1, -1, 1, 1)
    return y.astype(x.dtype)


if __name__ == "__main__":
    key = jax.random.PRNGKey(0)
    N, C, H, W = 2, 4, 16, 16
    kx, kg, kb = jax.random.split(key, 3)
    x = jax.random.normal(kx, (N, C, H, W), dtype=jnp.float32)
    # Deterministic parameter init (ones/zeros perturbed so the affine path is
    # exercised non-trivially).
    gamma = jnp.ones((C,), jnp.float32) + 0.1 * jax.random.normal(kg, (C,))
    beta = jnp.zeros((C,), jnp.float32) + 0.1 * jax.random.normal(kb, (C,))

    y = layernorm2d(x, gamma, beta, eps=1e-6)
    jax.block_until_ready(y)

    y_ref = _reference(x, gamma, beta, eps=1e-6)
    assert jnp.allclose(y, y_ref, atol=1e-4, rtol=1e-4), "mismatch vs reference"
    print("KERNEL_OK")
</pallas_src>

<mosaic_0001>
module attributes {stable_mosaic.version = 11 : i64} {
  func.func @_layernorm2d_kernel(%arg0: i32, %arg1: memref<1x8x128xf32, #tpu.memory_space<vmem>>, %arg2: memref<8x1xf32, #tpu.memory_space<vmem>>, %arg3: memref<8x1xf32, #tpu.memory_space<vmem>>, %arg4: memref<1x8x128xf32, #tpu.memory_space<vmem>>) attributes {dimension_semantics = [#tpu.dimension_semantics<parallel>], iteration_bounds = array<i64: 2>, scalar_prefetch = 0 : i64, scratch_operands = 0 : i64, tpu.core_type = #tpu.core_type<tc>, window_params = [{transform_indices = @transform_0, window_bounds = array<i64: 1, 8, 128>}, {pipeline_mode = #tpu.pipeline_mode<synchronous>, transform_indices = @transform_1, window_bounds = array<i64: 8, 1>}, {pipeline_mode = #tpu.pipeline_mode<synchronous>, transform_indices = @transform_2, window_bounds = array<i64: 8, 1>}, {transform_indices = @transform_3, window_bounds = array<i64: 1, 8, 128>}]} {
    %c0 = arith.constant 0 : index
    %c0_0 = arith.constant 0 : index
    %c0_1 = arith.constant 0 : index
    %0 = vector.load %arg1[%c0, %c0_0, %c0_1] : memref<1x8x128xf32, #tpu.memory_space<vmem>>, vector<1x8x128xf32>
    %1 = vector.shape_cast %0 : vector<1x8x128xf32> to vector<1x1x8x128xf32>
    %cst = arith.constant dense<0.000000e+00> : vector<1xf32>
    %2 = vector.multi_reduction <add>, %1, %cst [1, 2, 3] : vector<1x1x8x128xf32> to vector<1xf32>
    %3 = vector.shape_cast %2 : vector<1xf32> to vector<1x1x1x1xf32>
    %4 = vector.extract %3[0, 0, 0, 0] : f32 from vector<1x1x1x1xf32>
    %5 = arith.mulf %0, %0 : vector<1x8x128xf32>
    %6 = vector.shape_cast %5 : vector<1x8x128xf32> to vector<1x1x8x128xf32>
    %cst_2 = arith.constant dense<0.000000e+00> : vector<1xf32>
    %7 = vector.multi_reduction <add>, %6, %cst_2 [1, 2, 3] : vector<1x1x8x128xf32> to vector<1xf32>
    %8 = vector.shape_cast %7 : vector<1xf32> to vector<1x1x1x1xf32>
    %9 = vector.extract %8[0, 0, 0, 0] : f32 from vector<1x1x1x1xf32>
    %cst_3 = arith.constant 1.024000e+03 : f32
    %10 = arith.divf %4, %cst_3 : f32
    %11 = arith.mulf %4, %10 : f32
    %12 = arith.subf %9, %11 : f32
    %cst_4 = arith.constant 0.000000e+00 : f32
    %13 = arith.maximumf %12, %cst_4 : f32
    %cst_5 = arith.constant 1.023000e+03 : f32
    %14 = arith.divf %13, %cst_5 : f32
    %15 = math.sqrt %14 : f32
    %cst_6 = arith.constant 9.99999997E-7 : f32
    %16 = arith.addf %15, %cst_6 : f32
    %cst_7 = arith.constant 1.000000e+00 : f32
    %17 = arith.divf %cst_7, %16 : f32
    %c0_8 = arith.constant 0 : index
    %c0_9 = arith.constant 0 : index
    %18 = vector.load %arg2[%c0_8, %c0_9] : memref<8x1xf32, #tpu.memory_space<vmem>>, vector<8x1xf32>
    %19 = vector.broadcast %17 : f32 to vector<8x1xf32>
    %20 = arith.mulf %18, %19 : vector<8x1xf32>
    %c0_10 = arith.constant 0 : index
    %c0_11 = arith.constant 0 : index
    %21 = vector.load %arg3[%c0_10, %c0_11] : memref<8x1xf32, #tpu.memory_space<vmem>>, vector<8x1xf32>
    %22 = vector.broadcast %10 : f32 to vector<8x1xf32>
    %23 = arith.mulf %22, %20 : vector<8x1xf32>
    %24 = arith.subf %21, %23 : vector<8x1xf32>
    %25 = vector.shape_cast %20 : vector<8x1xf32> to vector<1x8x1xf32>
    %26 = vector.broadcast %25 : vector<1x8x1xf32> to vector<1x8x128xf32>
    %27 = arith.mulf %0, %26 : vector<1x8x128xf32>
    %28 = vector.shape_cast %24 : vector<8x1xf32> to vector<1x8x1xf32>
    %29 = vector.broadcast %28 : vector<1x8x1xf32> to vector<1x8x128xf32>
    %30 = arith.addf %27, %29 : vector<1x8x128xf32>
    %c0_12 = arith.constant 0 : index
    %c0_13 = arith.constant 0 : index
    %c0_14 = arith.constant 0 : index
    %31 = vector.load %arg4[%c0_12, %c0_13, %c0_14] : memref<1x8x128xf32, #tpu.memory_space<vmem>>, vector<1x8x128xf32>
    tpu.vector_store %arg4[%c0_12, %c0_13, %c0_14], %30 {strides = array<i32>} : memref<1x8x128xf32, #tpu.memory_space<vmem>>, vector<1x8x128xf32>,
    return
  }
  func.func @transform_0(%arg0: i32) -> (i32, i32, i32) {
    %c0_i32 = arith.constant 0 : i32
    %c0_i32_0 = arith.constant 0 : i32
    %c0_i32_1 = arith.constant 0 : i32
    return %arg0, %c0_i32, %c0_i32_0 : i32, i32, i32
  }
  func.func @transform_1(%arg0: i32) -> (i32, i32) {
    %c0_i32 = arith.constant 0 : i32
    %c0_i32_0 = arith.constant 0 : i32
    %c0_i32_1 = arith.constant 0 : i32
    return %c0_i32, %c0_i32_0 : i32, i32
  }
  func.func @transform_2(%arg0: i32) -> (i32, i32) {
    %c0_i32 = arith.constant 0 : i32
    %c0_i32_0 = arith.constant 0 : i32
    %c0_i32_1 = arith.constant 0 : i32
    return %c0_i32, %c0_i32_0 : i32, i32
  }
  func.func @transform_3(%arg0: i32) -> (i32, i32, i32) {
    %c0_i32 = arith.constant 0 : i32
    %c0_i32_0 = arith.constant 0 : i32
    %c0_i32_1 = arith.constant 0 : i32
    return %arg0, %c0_i32, %c0_i32_0 : i32, i32, i32
  }
}

</mosaic_0001>

<bundles_post_ra>
// kernel: tpu_custom_call.1
= control target key start
LH: loop header
LB: loop body
LE: loop exit
PB: predicated region body
PF: predicated region fallthrough
CT: control target
= control target key end

     0   :  { %8 = vsyncpa [#allocation3], 0  ;;  %s554_s0 = inlined_call_operand.vmem [shape: f32[2,8,128], index: 0, kind: input, shape index: {}]   ;;  %s555_s1 = inlined_call_operand.vmem [shape: f32[8,1], index: 1, kind: input, shape index: {}]   ;;  %s556_s2 = inlined_call_operand.vmem [shape: f32[8,1], index: 2, kind: input, shape index: {}]   ;;  %s557_s3 = inlined_call_operand.hbm [shape: f32[2,8,128], index: 3, kind: output, shape index: {}]  }
   0x1   :  { %10 = vsyncpa [#allocation3 + $0x1], 0  ;;  %s451_s12 = smov 0   ;;  %s453_s13 = smov 0  }
   0x2   :  { %s455_s14 = smov 0   ;;  %s457_s15 = smov 0  }
   0x3 LB: > { %s472_s16 = sadd.s32 4294967295, %s426_s15   ;;  %s301_s17 = sadd.s32 4294967294, %s426_s15   ;;  %s426_s15 = sphi %s457_s15, %s563_s15   ;;  %s422_s14 = sphi %s455_s14, %s562_s14   ;;  %s418_s13 = sphi %s453_s13, %s561_s13   ;;  %s414_s12 = sphi %s451_s12, %s560_s12  }
   0x4   : > { %s476_s18 = sadd.s32 1, %s426_s15   ;;  %s91_s19 = sadd.s32 1, %s422_s14 }
   0x5   : > { %s88_s20 = ssub.s32 %s426_s15, %s476_s18  ;;  %p101_p0 = scmp.ne.s32.totalorder %s422_s14, %s418_s13 }
   0x6   : > { %p89_p1 = scmp.eq.s32.totalorder %s88_s20, 0  ;;  %p102_p2 = scmp.eq.s32.totalorder %s472_s16, 1 }
   0x7   : > { %p107_p3 = scmp.ne.s32.totalorder %s418_s13, %s414_s12  ;;  %p108_p4 = scmp.eq.s32.totalorder %s301_s17, 1 }
   0x8   : > { %s487_s21 = scalar_select %p89_p1, %s422_s14, %s91_s19  }
   0x9   : > { %p489_p5 = por %p102_p2, %p101_p0  ;;  %p493_p6 = por %p108_p4, %p107_p3 }
   0xa   : > { %p304_p7 = scmp.ge.s32.totalorder %s426_s15, 1  ;;  %p139_p8 = scmp.lt.s32.totalorder %s426_s15, 3 }
   0xc   : > { %p140_p9 = pnand %p304_p7, %p139_p8 }
   0xd   : > { %p162_p10 = scmp.lt.s32.totalorder (!%p140_p9), %s472_s16, 1  ;;  %s428_s7 = smov (!%p140_p9), 0.0  }
   0xe   : > { %143 = sbr.rel (%p140_p9) target bundleno = 515 (0x203), region = 32  ;;  %s159_s26 = sand.u32 (!%p140_p9), 1, %s418_s13  }
   0xf   : > { %s305_s27 = sshll.u32 (!%p140_p9), %s159_s26, 3 }
  0x13   : > { %s163_s24 = scalar_select %p162_p10, %s472_s16, 1  ;;  %v429_v17 = vmov 0   ;;  %v208_v25 = vld [vmem:[%s555_s1] sm:$0xff] }
  0x14   : > { %360 = vset.pattern.permute.xlu1 %v429_v17  ;;  %361 = vset.pattern.permute.xlu0 %v429_v17  ;;  %v211_v29 = vld [vmem:[%s556_s2] sm:$0xff] }
  0x15   : > { %s306_s25 = sshll.u32 %s163_s24, 3 }
  0x16   : > { %s165_s28 = scalar_lea.vmem %s554_s0, %s306_s25 }
  0x17   : > { %v504_v0 = vld [vmem:[%s165_s28] sm:$0xff]  ;;  %s308_s28 = sshll.u32 %s472_s16, 7 }
  0x18   : > { %167 = vadd.xlane.f32.xlu0 %v504_v0  ;;  %v176_v1 = vmul.f32 %v504_v0, %v504_v0 }
  0x1c   : > { %177 = vadd.xlane.f32.xlu0 %v176_v1 }
  0xa1   : > { %v168_v2 = vpop.xlane.xlu0 %167 }
  0xa2   : > { %v169_v3 = vrot.slane %v168_v2, 4 }
  0xa4   : > { %v170_v4 = vadd.f32 %v169_v3, %v168_v2 }
  0xa5   : > { %v178_v5 = vpop.xlane.xlu0 %177 }
  0xa6   : > { %v171_v6 = vrot.slane %v170_v4, 2  ;;  %v179_v7 = vrot.slane %v178_v5, 4 }
  0xa8   : > { %v180_v8 = vadd.f32 %v179_v7, %v178_v5  ;;  %v172_v9 = vadd.f32 %v171_v6, %v170_v4 }
  0xaa   : > { %v181_v10 = vrot.slane %v180_v8, 2  ;;  %v173_v11 = vrot.slane %v172_v9, 1 }
  0xac   : > { %v182_v12 = vadd.f32 %v181_v10, %v180_v8  ;;  %v174_v13 = vadd.f32 %v173_v11, %v172_v9 }
  0xae   : > { %311 = vpush %v174_v13  ;;  %v183_v14 = vrot.slane %v182_v12, 1 }
  0xb0   : > { %v184_v15 = vadd.f32 %v183_v14, %v182_v12 }
  0xb2   : > { %313 = vpush %v184_v15 }
  0xdf   : > { %s509_s29 = spop %311 }
  0xe0   : > { %s188_s30 = smul.f32 0.0009765625, %s509_s29 }
  0xe2   : > { %s189_s4 = smul.f32 %s509_s29, %s188_s30  ;;  %v212_v28 = vstv %s188_s30  ;;  %s161_s29 = scalar_lea.vmem [#allocation2], %s305_s27 }
  0xe3   : > { %s314_s5 = spop %313 }
  0xe4   : > { %s190_s6 = ssub.f32 %s314_s5, %s189_s4  ;;  %s242_s4 = sshll.u32 %s161_s29, 4  ;;  %s243_s4 = int_to_ptr.vmem [resolvable:$true] %s242_s4 }
  0xe6   : > { %s191_s8 = smax.f32 %s428_s7, %s190_s6  ;;  %s240_s6 = scalar_lea.hbm %s557_s3, %s308_s28 }
  0xe7   : > { %s194_s9 = smul.f32 0.0009775171, %s191_s8  ;;  %s229_s7 = scalar_lea.sflag [#allocation3], %s159_s26 }
  0xe8   : > { %s366_s8 = scalar_lea.vmem %s243_s4, 128 }
  0xe9   : > { %v195_v16 = vstv %s194_s9  ;;  %p367_p11 = scmp.ne.s32.totalorder %s243_s4, %s366_s8  ;;  %s430_s9 = smov [#allocation2]  }
  0xea   : > { %362 = vrsqrt.f32 %v195_v16  ;;  %vm198_vm0 = vcmp.eq.f32.partialorder %v195_v16, inf  ;;  %v201_v20 = vand.u32 2147483648, %v195_v16  ;;  %vm200_vm1 = vcmp.eq.f32.partialorder %v195_v16, 0.0  ;;  %s370_s16 = sshll.u32 %s430_s9, 4  ;;  %s371_s16 = int_to_ptr.vmem [resolvable:$false] %s370_s16 }
  0xeb   : > { %p368_p12 = pnand %p367_p11, %p489_p5  ;;  %p373_p0 = scmp.lt.s32.totalorder %s243_s4, %s371_s16 }
  0xed   : > { %p369_p13 = pneg %p368_p12 }
  0xf7   : > { %v363_v18 = vpop.eup %362 }
  0xf8   : > { %v197_v19 = vmul.f32 %v363_v18, %v195_v16 }
  0xfa   : > { %v199_v21 = vsel %vm198_vm0, %v195_v16, %v197_v19 }
  0xfb   : > { %v202_v22 = vsel %vm200_vm1, %v201_v20, %v199_v21 }
  0xfc   : > { %315 = vpush %v202_v22 }
 0x12d   : > { %s316_s10 = spop %315 }
 0x12e   : > { %s204_s11 = sadd.f32 1e-06, %s316_s10  ;;  %s372_s10 = scalar_lea.vmem %s371_s16, 256 }
 0x12f   : > { %p374_p1 = scmp.lt.s32.totalorder %s372_s10, %s366_s8 }
 0x130   : > { %v205_v23 = vstv %s204_s11 }
 0x131   : > { %364 = vrcp.f32 %v205_v23  ;;  %p375_p2 = por %p374_p1, %p373_p0 }
 0x133   : > { %p376_p3 = pnand %p375_p2, %p369_p13 }
 0x13e   : > { %v365_v24 = vpop.eup %364 }
 0x13f   : > { %317 = vpush %v365_v24 }
 0x170   : > { %s318_s20 = spop %317 }
 0x171   : > { %v209_v26 = vstv %s318_s20 }
 0x172   : > { %v210_v27 = vmul.f32 %v209_v26, %v208_v25 }
 0x174   : > { %v213_v30 = vmul.f32 %v212_v28, %v210_v27  ;;  %217 = vperm.xlu1 %360, %v210_v27  }
 0x176   : > { %v214_v31 = vsub.f32 %v211_v29, %v213_v30 }
 0x178   : > { %223 = vperm.xlu1 %360, %v214_v31  }
 0x1ef   : > { %v218_v32 = vpop.permute.xlu1 %217 }
 0x1f0   : > { %v220_v33 = vmul.f32 %v218_v32, %v504_v0 }
 0x1f3   : > { %v224_v34 = vpop.permute.xlu1 %223 }
 0x1f4   : > { %v226_v35 = vadd.f32 %v224_v34, %v220_v33 }
 0x1f6   : > { %227 = vst [vmem:[%s161_s29] sm:$0xff] %v226_v35 }
 0x1f7   : > { %379 = shalt.err (!%p376_p3)
}
 0x1f8   : > { %s380_s11 = scalar_lea.hbm %s240_s6, 128  ;;  %s384_s20 = scalar_lea.hbm %s557_s3, 256 }
 0x1f9   : > { %p381_p4 = scmp.ne.s32.totalorder %s240_s6, %s380_s11  ;;  %p385_p9 = scmp.lt.s32.totalorder %s240_s6, %s557_s3 }
 0x1fa   : > { %p386_p10 = scmp.lt.s32.totalorder %s384_s20, %s380_s11 }
 0x1fb   : > { %p382_p7 = pnand %p381_p4, %p489_p5 }
 0x1fc   : > { %p387_p11 = por %p386_p10, %p385_p9 }
 0x1fd   : > { %p383_p8 = pneg %p382_p7 }
 0x1ff   : > { %p388_p12 = pnand %p387_p11, %p383_p8 }
 0x201   : > { %391 = shalt.err (!%p388_p12)
}
 0x202   : > { %319 = dma.vmem_to_hbm [thread:$0]  (%p489_p5), %s243_s4, 128, %s240_s6, %s229_s7  }
 0x203 PF: > { %p325_p13 = scmp.ge.s32.totalorder %s426_s15, 2  ;;  %s254_s26 = sand.u32 1, %s414_s12  }
 0x204   : > { %s255_s27 = scalar_lea.sflag [#allocation3], %s254_s26 }
 0x205   : > { %p322_p0 = pnand %p325_p13, %p493_p6 }
 0x207   : > { %p323_p1 = pneg %p322_p0 }
 0x209   : > { %409 = dma.done.wait (%p323_p1), %s255_s27, 128  }
 0x20a   : > { %411 = vsyncadd (%p323_p1), %s255_s27, 4294967168  ;;  %p13_p2 = scmp.ge.s32.totalorder %s476_s18, 4   ;;  %s560_s12 = smov %s418_s13 }
 0x20b   : > { %s561_s13 = smov %s422_s14  ;;  %s562_s14 = smov %s487_s21 }
 0x20c   : > { %s563_s15 = smov %s476_s18  ;;  %15 = sbr.rel (!%p13_p2) target bundleno = 3 (0x3), region = 67 }
 0x211   :  { %260 = vsyncpa [#allocation3], 1 }
 0x212   :  { %262 = vsyncpa [#allocation3 + $0x1], 1 }

</bundles_post_ra>
